<compile_context>
chip_gen: v6e
topology: v6e:2x2x1
jax: 0.10.0
libtpu: 0.0.40
codegen_flags: <defaults>
</compile_context>

<pallas_src>
import functools

import jax
import jax.numpy as jnp
from jax.experimental import pallas as pl
from jax.experimental.pallas import tpu as pltpu

LANE = 128


# ----------------------------- Pallas kernel ---------------------------------
def _mlp_kernel(x_ref, w0_ref, b0_ref, w1_ref, b1_ref, w2_ref, b2_ref, mean_ref):
    """Forward of the whole MLP on one batch tile.

    All weights/biases are full-array VMEM tiles (constant index_map -> resident
    across grid steps). Matmuls accumulate in f32 on the MXU; tanh runs on the
    EUP over the f32 accumulator.
    """
    x = x_ref[...]

    # layer 0: Linear(ob_dim -> size) + tanh
    h = jnp.tanh(
        jnp.dot(x, w0_ref[...], preferred_element_type=jnp.float32) + b0_ref[...]
    )

    # layer 1: Linear(size -> size) + tanh   (n_layers - 1 = 1 hidden layer)
    h = jnp.tanh(
        jnp.dot(h, w1_ref[...], preferred_element_type=jnp.float32) + b1_ref[...]
    )

    # output layer: Linear(size -> ac_dim_padded), no activation.
    # Output slab is lane-dense (padded to a multiple of 128) -> unmasked stores.
    out = jnp.dot(h, w2_ref[...], preferred_element_type=jnp.float32) + b2_ref[...]
    mean_ref[...] = out.astype(mean_ref.dtype)


# ----------------------------- Python wrapper ---------------------------------
@functools.partial(jax.jit, static_argnames=("discrete",))
def mlp_forward(x, params, discrete=False):
    """params: dict with w0,b0,w1,b1,w2,b2,logstd (weights already (in, out))."""
    batch, ob_dim = x.shape
    size = params["w0"].shape[1]
    ac_dim = params["w2"].shape[1]

    # ---- lane-dense output: pad the final out-feature dim to a multiple of 128
    ac_pad = ((ac_dim + LANE - 1) // LANE) * LANE
    w2 = jnp.pad(params["w2"], ((0, 0), (0, ac_pad - ac_dim)))
    b2 = jnp.pad(params["b2"], (0, ac_pad - ac_dim)).reshape(1, ac_pad)
    b0 = params["b0"].reshape(1, size)
    b1 = params["b1"].reshape(1, size)

    # ---- batch tiling: large tiles amortize per-step overhead; pad batch so
    # the tile divides it evenly (sublane dim stays a multiple of 8).
    batch8 = ((batch + 7) // 8) * 8
    tile_b = min(512, batch8)
    batch_pad = ((batch8 + tile_b - 1) // tile_b) * tile_b
    x_p = jnp.pad(x, ((0, batch_pad - batch), (0, 0))) if batch_pad != batch else x
    n_tiles = batch_pad // tile_b

    resident = lambda shape: pl.BlockSpec(shape, lambda i: (0, 0))  # weights stay in VMEM

    mean_pad = pl.pallas_call(
        _mlp_kernel,
        out_shape=jax.ShapeDtypeStruct((batch_pad, ac_pad), jnp.float32),
        grid=(n_tiles,),
        in_specs=[
            pl.BlockSpec((tile_b, ob_dim), lambda i: (i, 0)),  # x: tiled over batch
            resident(params["w0"].shape), resident(b0.shape),
            resident(params["w1"].shape), resident(b1.shape),
            resident(w2.shape), resident(b2.shape),
        ],
        out_specs=pl.BlockSpec((tile_b, ac_pad), lambda i: (i, 0)),
        compiler_params=pltpu.CompilerParams(
            dimension_semantics=("parallel",),  # batch shards across TCs on v7x
        ),
    )(x_p, params["w0"], b0, params["w1"], b1, w2, b2)

    mean = mean_pad[:batch, :ac_dim]

    if discrete:
        return mean
    # std is x-independent: compute once in the wrapper, not in the kernel.
    std = jnp.exp(params["logstd"])
    return mean, std


# ----------------------------- Deterministic init -----------------------------
def init_params(key, ob_dim, ac_dim, n_layers, size):
    assert n_layers == 2, "this script instantiates the module with n_layers=2"
    ks = jax.random.split(key, 6)

    def linear(kw, kb, fan_in, fan_out):
        # torch.nn.Linear default init: U(-1/sqrt(fan_in), 1/sqrt(fan_in))
        bound = 1.0 / jnp.sqrt(fan_in)
        w = jax.random.uniform(kw, (fan_in, fan_out), jnp.float32, -bound, bound)
        b = jax.random.uniform(kb, (fan_out,), jnp.float32, -bound, bound)
        return w, b

    w0, b0 = linear(ks[0], ks[1], ob_dim, size)
    w1, b1 = linear(ks[2], ks[3], size, size)
    w2, b2 = linear(ks[4], ks[5], size, ac_dim)
    logstd = jnp.zeros((ac_dim,), jnp.float32)  # nn.Parameter(torch.zeros(ac_dim))
    return dict(w0=w0, b0=b0, w1=w1, b1=b1, w2=w2, b2=b2, logstd=logstd)


# ----------------------------- Pure-JAX reference ------------------------------
def mlp_ref(x, p):
    h = jnp.tanh(x @ p["w0"] + p["b0"])
    h = jnp.tanh(h @ p["w1"] + p["b1"])
    mean = h @ p["w2"] + p["b2"]
    return mean, jnp.exp(p["logstd"])


if __name__ == "__main__":
    # MLP(ac_dim=2, ob_dim=4, n_layers=2, size=32, device=..., discrete=False)
    ob_dim, ac_dim, n_layers, size = 4, 2, 2, 32
    batch = 8

    key = jax.random.PRNGKey(0)
    kx, kp = jax.random.split(key)
    x = jax.random.normal(kx, (batch, ob_dim), jnp.float32)
    params = init_params(kp, ob_dim, ac_dim, n_layers, size)

    mean, std = mlp_forward(x, params, discrete=False)
    jax.block_until_ready((mean, std))

    ref_mean, ref_std = mlp_ref(x, params)
    assert mean.shape == (batch, ac_dim) and std.shape == (ac_dim,)
    assert jnp.allclose(mean, ref_mean, atol=1e-5, rtol=1e-5)
    assert jnp.allclose(std, ref_std, atol=1e-6, rtol=1e-6)

    # Also exercise the discrete path (mean only).
    mean_d = mlp_forward(x, params, discrete=True)
    jax.block_until_ready(mean_d)
    assert jnp.allclose(mean_d, ref_mean, atol=1e-5, rtol=1e-5)

    print("KERNEL_OK")
</pallas_src>

<mosaic_0001>
module attributes {stable_mosaic.version = 11 : i64} {
  func.func @_mlp_kernel(%arg0: i32, %arg1: memref<8x4xf32, #tpu.memory_space<vmem>>, %arg2: memref<4x32xf32, #tpu.memory_space<vmem>>, %arg3: memref<1x32xf32, #tpu.memory_space<vmem>>, %arg4: memref<32x32xf32, #tpu.memory_space<vmem>>, %arg5: memref<1x32xf32, #tpu.memory_space<vmem>>, %arg6: memref<32x128xf32, #tpu.memory_space<vmem>>, %arg7: memref<1x128xf32, #tpu.memory_space<vmem>>, %arg8: memref<8x128xf32, #tpu.memory_space<vmem>>) attributes {dimension_semantics = [#tpu.dimension_semantics<parallel>], iteration_bounds = array<i64: 1>, scalar_prefetch = 0 : i64, scratch_operands = 0 : i64, tpu.core_type = #tpu.core_type<tc>, window_params = [{transform_indices = @transform_0, window_bounds = array<i64: 8, 4>}, {pipeline_mode = #tpu.pipeline_mode<synchronous>, transform_indices = @transform_1, window_bounds = array<i64: 4, 32>}, {pipeline_mode = #tpu.pipeline_mode<synchronous>, transform_indices = @transform_2, window_bounds = array<i64: 1, 32>}, {pipeline_mode = #tpu.pipeline_mode<synchronous>, transform_indices = @transform_3, window_bounds = array<i64: 32, 32>}, {pipeline_mode = #tpu.pipeline_mode<synchronous>, transform_indices = @transform_4, window_bounds = array<i64: 1, 32>}, {pipeline_mode = #tpu.pipeline_mode<synchronous>, transform_indices = @transform_5, window_bounds = array<i64: 32, 128>}, {pipeline_mode = #tpu.pipeline_mode<synchronous>, transform_indices = @transform_6, window_bounds = array<i64: 1, 128>}, {transform_indices = @transform_7, window_bounds = array<i64: 8, 128>}]} {
    %c0 = arith.constant 0 : index
    %c0_0 = arith.constant 0 : index
    %0 = vector.load %arg1[%c0, %c0_0] : memref<8x4xf32, #tpu.memory_space<vmem>>, vector<8x4xf32>
    %c0_1 = arith.constant 0 : index
    %c0_2 = arith.constant 0 : index
    %1 = vector.load %arg2[%c0_1, %c0_2] : memref<4x32xf32, #tpu.memory_space<vmem>>, vector<4x32xf32>
    %cst = arith.constant dense<0.000000e+00> : vector<8x32xf32>
    %2 = tpu.matmul %0, %1, %cst {dimension_numbers = #tpu.dot_dimension_numbers<[1], [0], [0], [1], [0, 0, 1, 1], [], []>} : vector<8x4xf32>, vector<4x32xf32>, vector<8x32xf32> -> vector<8x32xf32>
    %c0_3 = arith.constant 0 : index
    %c0_4 = arith.constant 0 : index
    %3 = vector.load %arg3[%c0_3, %c0_4] : memref<1x32xf32, #tpu.memory_space<vmem>>, vector<1x32xf32>
    %4 = vector.broadcast %3 : vector<1x32xf32> to vector<8x32xf32>
    %5 = arith.addf %2, %4 : vector<8x32xf32>
    %6 = math.tanh %5 : vector<8x32xf32>
    %c0_5 = arith.constant 0 : index
    %c0_6 = arith.constant 0 : index
    %7 = vector.load %arg4[%c0_5, %c0_6] : memref<32x32xf32, #tpu.memory_space<vmem>>, vector<32x32xf32>
    %cst_7 = arith.constant dense<0.000000e+00> : vector<8x32xf32>
    %8 = tpu.matmul %6, %7, %cst_7 {dimension_numbers = #tpu.dot_dimension_numbers<[1], [0], [0], [1], [0, 0, 1, 1], [], []>} : vector<8x32xf32>, vector<32x32xf32>, vector<8x32xf32> -> vector<8x32xf32>
    %c0_8 = arith.constant 0 : index
    %c0_9 = arith.constant 0 : index
    %9 = vector.load %arg5[%c0_8, %c0_9] : memref<1x32xf32, #tpu.memory_space<vmem>>, vector<1x32xf32>
    %10 = vector.broadcast %9 : vector<1x32xf32> to vector<8x32xf32>
    %11 = arith.addf %8, %10 : vector<8x32xf32>
    %12 = math.tanh %11 : vector<8x32xf32>
    %c0_10 = arith.constant 0 : index
    %c0_11 = arith.constant 0 : index
    %13 = vector.load %arg6[%c0_10, %c0_11] : memref<32x128xf32, #tpu.memory_space<vmem>>, vector<32x128xf32>
    %cst_12 = arith.constant dense<0.000000e+00> : vector<8x128xf32>
    %14 = tpu.matmul %12, %13, %cst_12 {dimension_numbers = #tpu.dot_dimension_numbers<[1], [0], [0], [1], [0, 0, 1, 1], [], []>} : vector<8x32xf32>, vector<32x128xf32>, vector<8x128xf32> -> vector<8x128xf32>
    %c0_13 = arith.constant 0 : index
    %c0_14 = arith.constant 0 : index
    %15 = vector.load %arg7[%c0_13, %c0_14] : memref<1x128xf32, #tpu.memory_space<vmem>>, vector<1x128xf32>
    %16 = vector.broadcast %15 : vector<1x128xf32> to vector<8x128xf32>
    %17 = arith.addf %14, %16 : vector<8x128xf32>
    %c0_15 = arith.constant 0 : index
    %c0_16 = arith.constant 0 : index
    %18 = vector.load %arg8[%c0_15, %c0_16] : memref<8x128xf32, #tpu.memory_space<vmem>>, vector<8x128xf32>
    tpu.vector_store %arg8[%c0_15, %c0_16], %17 {strides = array<i32>} : memref<8x128xf32, #tpu.memory_space<vmem>>, vector<8x128xf32>,
    return
  }
  func.func @transform_0(%arg0: i32) -> (i32, i32) {
    %c0_i32 = arith.constant 0 : i32
    %c0_i32_0 = arith.constant 0 : i32
    return %arg0, %c0_i32 : i32, i32
  }
  func.func @transform_1(%arg0: i32) -> (i32, i32) {
    %c0_i32 = arith.constant 0 : i32
    %c0_i32_0 = arith.constant 0 : i32
    %c0_i32_1 = arith.constant 0 : i32
    return %c0_i32, %c0_i32_0 : i32, i32
  }
  func.func @transform_2(%arg0: i32) -> (i32, i32) {
    %c0_i32 = arith.constant 0 : i32
    %c0_i32_0 = arith.constant 0 : i32
    %c0_i32_1 = arith.constant 0 : i32
    return %c0_i32, %c0_i32_0 : i32, i32
  }
  func.func @transform_3(%arg0: i32) -> (i32, i32) {
    %c0_i32 = arith.constant 0 : i32
    %c0_i32_0 = arith.constant 0 : i32
    %c0_i32_1 = arith.constant 0 : i32
    return %c0_i32, %c0_i32_0 : i32, i32
  }
  func.func @transform_4(%arg0: i32) -> (i32, i32) {
    %c0_i32 = arith.constant 0 : i32
    %c0_i32_0 = arith.constant 0 : i32
    %c0_i32_1 = arith.constant 0 : i32
    return %c0_i32, %c0_i32_0 : i32, i32
  }
  func.func @transform_5(%arg0: i32) -> (i32, i32) {
    %c0_i32 = arith.constant 0 : i32
    %c0_i32_0 = arith.constant 0 : i32
    %c0_i32_1 = arith.constant 0 : i32
    return %c0_i32, %c0_i32_0 : i32, i32
  }
  func.func @transform_6(%arg0: i32) -> (i32, i32) {
    %c0_i32 = arith.constant 0 : i32
    %c0_i32_0 = arith.constant 0 : i32
    %c0_i32_1 = arith.constant 0 : i32
    return %c0_i32, %c0_i32_0 : i32, i32
  }
  func.func @transform_7(%arg0: i32) -> (i32, i32) {
    %c0_i32 = arith.constant 0 : i32
    %c0_i32_0 = arith.constant 0 : i32
    return %arg0, %c0_i32 : i32, i32
  }
}

</mosaic_0001>

<bundles_post_ra>
// kernel: mlp_forward.1
= control target key start
LH: loop header
LB: loop body
LE: loop exit
PB: predicated region body
PF: predicated region fallthrough
CT: control target
= control target key end

     0   :  { %vm39_vm0 = vcmask 1043456   ;;  %vm35_vm1 = vcmask 31744   ;;  %v341_v0 = vmov 0.0   ;;  %vm342_vm2 = vmmov 0   ;;  %s427_s1 = inlined_call_operand.vmem [shape: f32[4,32], index: 1, kind: input, shape index: {}]   ;;  %s428_s0 = inlined_call_operand.vmem [shape: f32[8,4], index: 0, kind: input, shape index: {}]   ;;  %s429_s3 = inlined_call_operand.vmem [shape: f32[32,32], index: 3, kind: input, shape index: {}]   ;;  %s430_s2 = inlined_call_operand.vmem [shape: f32[1,32], index: 2, kind: input, shape index: {}]   ;;  %s431_s5 = inlined_call_operand.vmem [shape: f32[32,128], index: 5, kind: input, shape index: {}]   ;;  %s432_s4 = inlined_call_operand.vmem [shape: f32[1,32], index: 4, kind: input, shape index: {}]   ;;  %s433_s6 = inlined_call_operand.vmem [shape: f32[1,128], index: 6, kind: input, shape index: {}]   ;;  %s434_s7 = inlined_call_operand.vmem [shape: f32[8,128], index: 7, kind: output, shape index: {}]  }
   0x1   :  { %308 = vmatprep.subr.mxu0 %v341_v0  ;;  %v27_v1 = vld [vmem:[%s427_s1] sm:$0xf]  ;;  %310 = vmatprep.mubr.msk.f32.mxu0 %vm342_vm2, %v341_v0  ;;  %v117_v3 = vld [vmem:[%s429_s3 + $0x18] sm:$0xff]  ;;  %v116_v4 = vld [vmem:[%s429_s3 + $0x10] sm:$0xff]  ;;  %vm125_vm3 = vcmask 261120  }
   0x2   :  { %v26_v2 = vld [vmem:[%s428_s0] sm:$0xff]  ;;  %309 = vmatpush3.msk.msra.mxu0 %vm39_vm0, %v27_v1  ;;  %313 = vmatprep.subr.mxu1 %v341_v0  ;;  %v115_v5 = vld [vmem:[%s429_s3 + $0x8] sm:$0xff]  ;;  %v203_v12 = vld [vmem:[%s431_s5 + $0x18] sm:$0xff] }
   0x3   :  { %311 = vmatmul.mubr.msk.f32.vlgmr.msra.gmra.mxu0 %vm35_vm1, %v26_v2  ;;  %321 = vmatprep.mubr.msk.f32.mxu1 %vm342_vm2, %v341_v0  ;;  %v114_v6 = vld [vmem:[%s429_s3] sm:$0xff]  ;;  %v202_v13 = vld [vmem:[%s431_s5 + $0x10] sm:$0xff]  ;;  %v201_v14 = vld [vmem:[%s431_s5 + $0x8] sm:$0xff] }
   0x4   :  { %324 = vmatprep.subr.mxu0 %v341_v0  ;;  %332 = vmatprep.mubr.msk.f32.mxu0 %vm342_vm2, %v341_v0  ;;  %v289_v7 = vld [vmem:[%s430_s2] ss:$0 sm:$0xff] }
   0x5   :  { %314 = vmatpush3.msra.mxu1 %v117_v3  ;;  %325 = vmatpush3.msra.mxu0 %v203_v12  ;;  %v200_v15 = vld [vmem:[%s431_s5] sm:$0xff] }
   0x6   :  { %315 = vmatprep.subr.mxu1 %v341_v0  ;;  %326 = vmatprep.subr.mxu0 %v341_v0  ;;  %v292_v16 = vld [vmem:[%s432_s4] ss:$0 sm:$0xff] }
   0x7   :  { %316 = vmatpush3.msra.mxu1 %v116_v4  ;;  %327 = vmatpush3.msra.mxu0 %v202_v13  ;;  %v294_v21 = vld [vmem:[%s433_s6] ss:$0 sm:$0xff] }
   0x8   :  { %317 = vmatprep.subr.mxu1 %v341_v0  ;;  %328 = vmatprep.subr.mxu0 %v341_v0 }
   0x9   :  { %318 = vmatpush3.msra.mxu1 %v115_v5  ;;  %329 = vmatpush3.msra.mxu0 %v201_v14 }
   0xa   :  { %319 = vmatprep.subr.mxu1 %v341_v0  ;;  %330 = vmatprep.subr.mxu0 %v341_v0 }
   0xb   :  { %320 = vmatpush3.msra.mxu1 %v114_v6  ;;  %331 = vmatpush3.msra.mxu0 %v200_v15 }
  0xc3   :  { %v109_v8 = vpop.f32.mrf.mxu0 }
  0xc4   :  { %v110_v9 = vadd.f32 %v289_v7, %v109_v8 }
  0xc5   :  { %v312_v10 = vpop.f32.mrf.mxu0 }
  0xc6   :  { %337 = vtanh.f32 %v110_v9 }
  0xd3   :  { %v338_v11 = vpop.eup %337 }
  0xd4   :  { %322 = vmatmul.mubr.msk.f32.vlgmr.msra.gmra.mxu1 %vm125_vm3, %v338_v11 }
 0x194   :  { %v195_v17 = vpop.f32.mrf.mxu1 }
 0x195   :  { %v196_v18 = vadd.f32 %v292_v16, %v195_v17 }
 0x196   :  { %v323_v19 = vpop.f32.mrf.mxu1 }
 0x197   :  { %339 = vtanh.f32 %v196_v18 }
 0x1a4   :  { %v340_v20 = vpop.eup %339 }
 0x1a5   :  { %333 = vmatmul.mubr.msk.f32.vlgmr.msra.gmra.mxu0 %vm125_vm3, %v340_v20 }
 0x265   :  { %v280_v22 = vpop.f32.mrf.mxu0 }
 0x266   :  { %v281_v23 = vadd.f32 %v294_v21, %v280_v22 }
 0x267   :  { %v334_v24 = vpop.f32.mrf.mxu0 }
 0x268   :  { %284 = vst [vmem:[%s434_s7] sm:$0xff] %v281_v23 }

</bundles_post_ra>
